<compile_context>
chip_gen: v7x
topology: tpu7x:2x2x1
jax: 0.10.0
libtpu: 0.0.40
codegen_flags: <defaults>
</compile_context>

<pallas_src>
import jax
import jax.numpy as jnp
from jax.experimental import pallas as pl
from jax.experimental.pallas import tpu as pltpu


def _round_up(x, m):
    return (x + m - 1) // m * m


def _pad2d(a, rows, cols, dtype):
    """Cast then zero-pad a 2-D array to (rows, cols). No-op when already there."""
    a = a.astype(dtype)          # fuses into the producer; no pass if dtype matches
    pr, pc = rows - a.shape[0], cols - a.shape[1]
    if pr == 0 and pc == 0:
        return a
    return jnp.pad(a, ((0, pr), (0, pc)))


def _largest_divisor_tile(n_p, target):
    """Largest multiple of 128 that divides n_p and is <= target (min 128)."""
    target = max(128, min(target, n_p))
    best, t = 128, 128
    while t <= target:
        if n_p % t == 0:
            best = t
        t += 128
    return best


def _vmem_capacity_bytes():
    try:
        cap = getattr(pltpu.get_tpu_info(), "vmem_capacity_bytes", None)
        if cap:
            return int(cap)
    except Exception:
        pass
    return 64 << 20              # conservative fallback (v7x per-TensorCore VMEM)


def _plan_tiling(n_p, f_p, h_p, l_p, db, target_tm, target_tk, force_resident):
    """Pick (tm, tk), x/hw residency, and the scoped-VMEM limit for this chip."""
    budget = (_vmem_capacity_bytes() * 3) // 4    # ~96 MiB on v5e/v6e, ~48 MiB on v7x
    budget = max(32 << 20, min(budget, 128 << 20))
    wide = max(f_p, l_p)

    # keep >= 2 row blocks when possible so v7x's 2 TensorCores both get work
    tm_cap = n_p // 2 if n_p >= 256 else n_p
    tm = _largest_divisor_tile(n_p, min(target_tm, tm_cap))
    tk = _largest_divisor_tile(n_p, target_tk)

    if force_resident is None:
        resident = 2 * n_p * wide * db <= budget // 3
    else:
        resident = bool(force_resident)

    def est(tm_, tk_, res):
        s1 = (2 * tm_ * tk_ * db                                   # A block (x2 buf)
              + (2 * n_p * f_p * db if res else 2 * tk_ * f_p * db)
              + 2 * (f_p * h_p + h_p * l_p) * db + 2 * h_p * 4     # weights / bias
              + 2 * tm_ * l_p * db                                 # hw out block
              + tm_ * f_p * 4)                                     # f32 accumulator
        s2 = (2 * tm_ * tk_ * db
              + (2 * n_p * l_p * db if res else 2 * tk_ * l_p * db)
              + 2 * (l_p * h_p + h_p * f_p) * db + 2 * (l_p + h_p + f_p) * 4
              + 2 * tm_ * (l_p + f_p) * 4                          # z / x_hat blocks
              + tm_ * l_p * 4)
        return max(s1, s2)

    while est(tm, tk, resident) > budget:
        if tk > 128:
            tk = _largest_divisor_tile(n_p, tk // 2)
        elif tm > 128:
            tm = _largest_divisor_tile(n_p, tm // 2)
        elif resident and force_resident is None:
            resident = False
        else:
            break

    return tm, tk, resident, int(budget)


# ---------------------------------------------------------------------------
# Stage 1 (encoder): accumulate (A @ x) over A-column blocks; in the last-k
# epilogue apply W1 + b1 + relu and W2.  Output hw = relu(A x W1 + b1) @ W2.
# ---------------------------------------------------------------------------
def _make_encoder_kernel(resident, tk):
    def kernel(a_ref, x_ref, w1_ref, b1_ref, w2_ref, hw_ref, acc_ref):
        k = pl.program_id(1)

        @pl.when(k == 0)
        def _():
            acc_ref[...] = jnp.zeros_like(acc_ref)

        if resident:
            # x is whole-array VMEM-resident; slice the current k column block.
            x_blk = x_ref[pl.ds(pl.multiple_of(k * tk, tk), tk), :]
        else:
            x_blk = x_ref[...]

        # Propagation through A in the narrow (padded input-feature) dim.
        acc_ref[...] += jnp.dot(a_ref[...], x_blk,
                                preferred_element_type=jnp.float32)

        @pl.when(k == pl.num_programs(1) - 1)
        def _():
            w1 = w1_ref[...]
            w2 = w2_ref[...]
            h1 = jnp.dot(acc_ref[...].astype(w1.dtype), w1,
                         preferred_element_type=jnp.float32) + b1_ref[...]
            h1 = jnp.maximum(h1, 0.0)
            hw = jnp.dot(h1.astype(w2.dtype), w2,
                         preferred_element_type=jnp.float32)
            hw_ref[...] = hw.astype(hw_ref.dtype)

    return kernel


# ---------------------------------------------------------------------------
# Stage 2 (second propagation + decoder): accumulate (A @ hw); in the last-k
# epilogue add b2 (-> z), run the two dense decoder layers, write z and x_hat.
# ---------------------------------------------------------------------------
def _make_decoder_kernel(resident, tk):
    def kernel(a_ref, hw_ref, b2_ref, w3_ref, b3_ref, w4_ref, b4_ref,
               z_ref, xhat_ref, acc_ref):
        k = pl.program_id(1)

        @pl.when(k == 0)
        def _():
            acc_ref[...] = jnp.zeros_like(acc_ref)

        if resident:
            hw_blk = hw_ref[pl.ds(pl.multiple_of(k * tk, tk), tk), :]
        else:
            hw_blk = hw_ref[...]

        acc_ref[...] += jnp.dot(a_ref[...], hw_blk,
                                preferred_element_type=jnp.float32)

        @pl.when(k == pl.num_programs(1) - 1)
        def _():
            w3 = w3_ref[...]
            w4 = w4_ref[...]
            z = acc_ref[...] + b2_ref[...]
            z_ref[...] = z.astype(z_ref.dtype)
            d1 = jnp.dot(z.astype(w3.dtype), w3,
                         preferred_element_type=jnp.float32) + b3_ref[...]
            d1 = jnp.maximum(d1, 0.0)
            xh = jnp.dot(d1.astype(w4.dtype), w4,
                         preferred_element_type=jnp.float32) + b4_ref[...]
            xhat_ref[...] = xh.astype(xhat_ref.dtype)

    return kernel


def dominant_forward(a_hat, x, params, *, compute_dtype=jnp.bfloat16,
                     target_tm=1024, target_tk=2048, x_resident=None):
    """Full DOMINANT forward. Returns (x_hat, z) as float32 [N,F], [N,L]."""
    w1, b1, w2, b2, w3, b3, w4, b4 = params
    n, f = x.shape
    h = w1.shape[1]
    l = w2.shape[1]

    # Lane-dense padded dims (multiples of 128); N padded to 128, NOT to tile.
    f_p = _round_up(f, 128)
    h_p = _round_up(h, 128)
    l_p = _round_up(l, 128)
    n_p = _round_up(n, 128)
    db = jnp.dtype(compute_dtype).itemsize

    tm, tk, resident, vmem_limit = _plan_tiling(
        n_p, f_p, h_p, l_p, db, target_tm, target_tk, x_resident)
    grid = (n_p // tm, n_p // tk)
    row_blocks = n_p // tm

    # bf16 inputs / weights; f32 biases (epilogue math stays f32).
    a_p = _pad2d(a_hat, n_p, n_p, compute_dtype)   # no extra pass if already bf16 & aligned
    x_p = _pad2d(x, n_p, f_p, compute_dtype)
    w1_p = _pad2d(w1, f_p, h_p, compute_dtype)
    w2_p = _pad2d(w2, h_p, l_p, compute_dtype)
    w3_p = _pad2d(w3, l_p, h_p, compute_dtype)
    w4_p = _pad2d(w4, h_p, f_p, compute_dtype)
    b1_p = _pad2d(b1.reshape(1, -1), 1, h_p, jnp.float32)
    b2_p = _pad2d(b2.reshape(1, -1), 1, l_p, jnp.float32)
    b3_p = _pad2d(b3.reshape(1, -1), 1, h_p, jnp.float32)
    b4_p = _pad2d(b4.reshape(1, -1), 1, f_p, jnp.float32)

    compiler_params = pltpu.CompilerParams(
        dimension_semantics=("parallel", "arbitrary"),
        vmem_limit_bytes=vmem_limit,
    )

    if resident:
        x_spec = pl.BlockSpec((n_p, f_p), lambda i, k: (0, 0))    # DMA'd once
        hw_spec = pl.BlockSpec((n_p, l_p), lambda i, k: (0, 0))   # DMA'd once
        x_bytes = n_p * f_p * db
        hw_bytes = n_p * l_p * db
    else:
        x_spec = pl.BlockSpec((tk, f_p), lambda i, k: (k, 0))     # re-read per row tile
        hw_spec = pl.BlockSpec((tk, l_p), lambda i, k: (k, 0))
        x_bytes = row_blocks * n_p * f_p * db
        hw_bytes = row_blocks * n_p * l_p * db

    # ---- stage 1: encoder --------------------------------------------------
    enc_cost = pl.CostEstimate(
        flops=2 * n_p * n_p * f_p + 2 * n_p * f_p * h_p + 2 * n_p * h_p * l_p,
        transcendentals=0,
        bytes_accessed=(n_p * n_p * db + x_bytes
                        + (f_p * h_p + h_p * l_p) * db + h_p * 4
                        + n_p * l_p * db),
    )
    hw = pl.pallas_call(
        _make_encoder_kernel(resident, tk),
        out_shape=jax.ShapeDtypeStruct((n_p, l_p), compute_dtype),
        grid_spec=pltpu.PrefetchScalarGridSpec(
            num_scalar_prefetch=0,
            grid=grid,
            in_specs=[
                pl.BlockSpec((tm, tk), lambda i, k: (i, k)),     # A_hat tile
                x_spec,                                          # x (resident/streamed)
                pl.BlockSpec((f_p, h_p), lambda i, k: (0, 0)),   # W1 (resident)
                pl.BlockSpec((1, h_p), lambda i, k: (0, 0)),     # b1 (resident)
                pl.BlockSpec((h_p, l_p), lambda i, k: (0, 0)),   # W2 (resident)
            ],
            out_specs=pl.BlockSpec((tm, l_p), lambda i, k: (i, 0)),
            scratch_shapes=[pltpu.VMEM((tm, f_p), jnp.float32)],
        ),
        compiler_params=compiler_params,
        cost_estimate=enc_cost,
    )(a_p, x_p, w1_p, b1_p, w2_p)

    # ---- stage 2: second propagation + decoder -----------------------------
    dec_cost = pl.CostEstimate(
        flops=2 * n_p * n_p * l_p + 2 * n_p * l_p * h_p + 2 * n_p * h_p * f_p,
        transcendentals=0,
        bytes_accessed=(n_p * n_p * db + hw_bytes
                        + (l_p * h_p + h_p * f_p) * db + (l_p + h_p + f_p) * 4
                        + n_p * (l_p + f_p) * 4),
    )
    z_p, xhat_p = pl.pallas_call(
        _make_decoder_kernel(resident, tk),
        out_shape=(jax.ShapeDtypeStruct((n_p, l_p), jnp.float32),
                   jax.ShapeDtypeStruct((n_p, f_p), jnp.float32)),
        grid_spec=pltpu.PrefetchScalarGridSpec(
            num_scalar_prefetch=0,
            grid=grid,
            in_specs=[
                pl.BlockSpec((tm, tk), lambda i, k: (i, k)),     # A_hat tile
                hw_spec,                                         # hw (resident/streamed)
                pl.BlockSpec((1, l_p), lambda i, k: (0, 0)),     # b2
                pl.BlockSpec((l_p, h_p), lambda i, k: (0, 0)),   # W3
                pl.BlockSpec((1, h_p), lambda i, k: (0, 0)),     # b3
                pl.BlockSpec((h_p, f_p), lambda i, k: (0, 0)),   # W4
                pl.BlockSpec((1, f_p), lambda i, k: (0, 0)),     # b4
            ],
            out_specs=(pl.BlockSpec((tm, l_p), lambda i, k: (i, 0)),
                       pl.BlockSpec((tm, f_p), lambda i, k: (i, 0))),
            scratch_shapes=[pltpu.VMEM((tm, l_p), jnp.float32)],
        ),
        compiler_params=compiler_params,
        cost_estimate=dec_cost,
    )(a_p, hw, b2_p, w3_p, b3_p, w4_p, b4_p)

    # strip padding (rows beyond N, lane padding beyond F / latent)
    return xhat_p[:n, :f], z_p[:n, :l]


def build_normalized_adjacency(edge_index, num_nodes, dtype=jnp.bfloat16):
    """A_hat = D^-1/2 (A + I) D^-1/2 (PyG gcn_norm with add_self_loops=True).

    Emitted directly in `dtype` (the cast fuses into the normalization multiply)
    so the kernel wrapper never re-materializes an f32 N^2 copy of A.
    """
    src, dst = edge_index[0], edge_index[1]
    a = jnp.zeros((num_nodes, num_nodes), jnp.float32).at[dst, src].add(1.0)
    a = jnp.minimum(a, 1.0)  # NOTE: collapses duplicate edges (unweighted graphs only)
    a = a + jnp.eye(num_nodes, dtype=jnp.float32)
    deg = jnp.sum(a, axis=1)
    dinv = jnp.where(deg > 0, 1.0 / jnp.sqrt(deg), 0.0)
    return (a * dinv[:, None] * dinv[None, :]).astype(dtype)


def init_params(key, input_dim, hidden_dim, latent_dim):
    """Deterministic Glorot-uniform-ish init; weights stored as [in, out]."""
    ks = jax.random.split(key, 4)

    def glorot(k, fan_in, fan_out):
        lim = jnp.sqrt(6.0 / (fan_in + fan_out))
        return jax.random.uniform(k, (fan_in, fan_out), jnp.float32, -lim, lim)

    w1 = glorot(ks[0], input_dim, hidden_dim)
    b1 = jnp.zeros((1, hidden_dim), jnp.float32)
    w2 = glorot(ks[1], hidden_dim, latent_dim)
    b2 = jnp.zeros((1, latent_dim), jnp.float32)
    w3 = glorot(ks[2], latent_dim, hidden_dim)
    b3 = jnp.zeros((1, hidden_dim), jnp.float32)
    w4 = glorot(ks[3], hidden_dim, input_dim)
    b4 = jnp.zeros((1, input_dim), jnp.float32)
    return (w1, b1, w2, b2, w3, b3, w4, b4)


def reference_forward(a_hat, x, params, compute_dtype=jnp.bfloat16):
    """Pure-JAX reference mirroring the kernel's bf16-input / f32-accum math."""
    w1, b1, w2, b2, w3, b3, w4, b4 = params
    cd, f32 = compute_dtype, jnp.float32
    ax = jnp.dot(a_hat.astype(cd), x.astype(cd), preferred_element_type=f32)
    h1 = jnp.maximum(jnp.dot(ax.astype(cd), w1.astype(cd),
                             preferred_element_type=f32) + b1, 0.0)
    hw = jnp.dot(h1.astype(cd), w2.astype(cd), preferred_element_type=f32).astype(cd)
    z = jnp.dot(a_hat.astype(cd), hw, preferred_element_type=f32) + b2
    d1 = jnp.maximum(jnp.dot(z.astype(cd), w3.astype(cd),
                             preferred_element_type=f32) + b3, 0.0)
    x_hat = jnp.dot(d1.astype(cd), w4.astype(cd), preferred_element_type=f32) + b4
    return x_hat, z


if __name__ == "__main__":
    key = jax.random.PRNGKey(0)
    k_x, k_p = jax.random.split(key)

    num_nodes = 200          # padded to 256
    input_dim = 16
    hidden_dim = 32
    latent_dim = 16

    # node features [N, F]
    x = jax.random.normal(k_x, (num_nodes, input_dim), jnp.float32)

    # simple symmetric ring graph as edge_index [2, E]
    src = jnp.arange(num_nodes, dtype=jnp.int32)
    dst = (src + 1) % num_nodes
    edge_index = jnp.stack([jnp.concatenate([src, dst]),
                            jnp.concatenate([dst, src])], axis=0)

    a_hat = build_normalized_adjacency(edge_index, num_nodes)   # bf16, no extra pass
    params = init_params(k_p, input_dim, hidden_dim, latent_dim)
    x_hat_ref, z_ref = reference_forward(a_hat, x, params)

    # resident x/hw path; small tiles force a 2x2 grid (exercises the k-reduction
    # and the in-kernel pl.ds slice of the resident operand)
    x_hat, z = dominant_forward(a_hat, x, params, target_tm=128, target_tk=128)
    jax.block_until_ready((x_hat, z))
    assert x_hat.shape == (num_nodes, input_dim)
    assert z.shape == (num_nodes, latent_dim)
    assert jnp.allclose(x_hat, x_hat_ref, atol=2e-2, rtol=2e-2)
    assert jnp.allclose(z, z_ref, atol=2e-2, rtol=2e-2)

    # streamed fallback path (what very large N would use)
    x_hat_s, z_s = dominant_forward(a_hat, x, params, target_tm=128, target_tk=128,
                                    x_resident=False)
    jax.block_until_ready((x_hat_s, z_s))
    assert jnp.allclose(x_hat_s, x_hat_ref, atol=2e-2, rtol=2e-2)
    assert jnp.allclose(z_s, z_ref, atol=2e-2, rtol=2e-2)

    # anomaly score (MSE per node), glue JAX mirror of compute_anomaly_score
    score = jnp.mean((x - x_hat) ** 2, axis=1)
    jax.block_until_ready(score)

    print("KERNEL_OK")
</pallas_src>

<mosaic_0001>
module attributes {stable_mosaic.version = 11 : i64} {
  func.func @kernel(%arg0: i32, %arg1: i32, %arg2: memref<128x128xbf16, #tpu.memory_space<vmem>>, %arg3: memref<256x128xbf16, #tpu.memory_space<vmem>>, %arg4: memref<128x128xbf16, #tpu.memory_space<vmem>>, %arg5: memref<1x128xf32, #tpu.memory_space<vmem>>, %arg6: memref<128x128xbf16, #tpu.memory_space<vmem>>, %arg7: memref<128x128xbf16, #tpu.memory_space<vmem>>, %arg8: memref<128x128xf32, #tpu.memory_space<vmem>>) attributes {dimension_semantics = [#tpu.dimension_semantics<parallel>, #tpu.dimension_semantics<arbitrary>], iteration_bounds = array<i64: 2, 2>, scalar_prefetch = 0 : i64, scratch_operands = 1 : i64, tpu.core_type = #tpu.core_type<tc>, window_params = [{transform_indices = @transform_0, window_bounds = array<i64: 128, 128>}, {pipeline_mode = #tpu.pipeline_mode<synchronous>, transform_indices = @transform_1, window_bounds = array<i64: 256, 128>}, {pipeline_mode = #tpu.pipeline_mode<synchronous>, transform_indices = @transform_2, window_bounds = array<i64: 128, 128>}, {pipeline_mode = #tpu.pipeline_mode<synchronous>, transform_indices = @transform_3, window_bounds = array<i64: 1, 128>}, {pipeline_mode = #tpu.pipeline_mode<synchronous>, transform_indices = @transform_4, window_bounds = array<i64: 128, 128>}, {transform_indices = @transform_5, window_bounds = array<i64: 128, 128>}]} {
    %c0_i32 = arith.constant 0 : i32
    %0 = arith.cmpi eq, %arg1, %c0_i32 : i32
    %1 = arith.extui %0 : i1 to i32
    %c0_i32_0 = arith.constant 0 : i32
    %2 = arith.cmpi ne, %1, %c0_i32_0 : i32
    scf.if %2 {
      %cst_8 = arith.constant 0.000000e+00 : f32
      %15 = vector.broadcast %cst_8 : f32 to vector<128x128xf32>
      %c0_9 = arith.constant 0 : index
      %c0_10 = arith.constant 0 : index
      %16 = vector.load %arg8[%c0_9, %c0_10] : memref<128x128xf32, #tpu.memory_space<vmem>>, vector<128x128xf32>
      tpu.vector_store %arg8[%c0_9, %c0_10], %15 {strides = array<i32>} : memref<128x128xf32, #tpu.memory_space<vmem>>, vector<128x128xf32>,
    } else {
    }
    %c128_i32 = arith.constant 128 : i32
    %3 = arith.muli %arg1, %c128_i32 : i32
    %4 = tpu.assume_multiple %3, 128 : i32
    %5 = arith.index_cast %4 : i32 to index
    %c0 = arith.constant 0 : index
    %6 = vector.load %arg3[%5, %c0] : memref<256x128xbf16, #tpu.memory_space<vmem>>, vector<128x128xbf16>
    %c0_1 = arith.constant 0 : index
    %c0_2 = arith.constant 0 : index
    %7 = vector.load %arg8[%c0_1, %c0_2] : memref<128x128xf32, #tpu.memory_space<vmem>>, vector<128x128xf32>
    %c0_3 = arith.constant 0 : index
    %c0_4 = arith.constant 0 : index
    %8 = vector.load %arg2[%c0_3, %c0_4] : memref<128x128xbf16, #tpu.memory_space<vmem>>, vector<128x128xbf16>
    %cst = arith.constant dense<0.000000e+00> : vector<128x128xf32>
    %9 = tpu.matmul %8, %6, %cst {dimension_numbers = #tpu.dot_dimension_numbers<[1], [0], [0], [1], [0, 0, 1, 1], [], []>} : vector<128x128xbf16>, vector<128x128xbf16>, vector<128x128xf32> -> vector<128x128xf32>
    %10 = arith.addf %7, %9 : vector<128x128xf32>
    %c0_5 = arith.constant 0 : index
    %c0_6 = arith.constant 0 : index
    %11 = vector.load %arg8[%c0_5, %c0_6] : memref<128x128xf32, #tpu.memory_space<vmem>>, vector<128x128xf32>
    tpu.vector_store %arg8[%c0_5, %c0_6], %10 {strides = array<i32>} : memref<128x128xf32, #tpu.memory_space<vmem>>, vector<128x128xf32>,
    %c1_i32 = arith.constant 1 : i32
    %12 = arith.cmpi eq, %arg1, %c1_i32 : i32
    %13 = arith.extui %12 : i1 to i32
    %c0_i32_7 = arith.constant 0 : i32
    %14 = arith.cmpi ne, %13, %c0_i32_7 : i32
    scf.if %14 {
      %c0_8 = arith.constant 0 : index
      %c0_9 = arith.constant 0 : index
      %15 = vector.load %arg4[%c0_8, %c0_9] : memref<128x128xbf16, #tpu.memory_space<vmem>>, vector<128x128xbf16>
      %c0_10 = arith.constant 0 : index
      %c0_11 = arith.constant 0 : index
      %16 = vector.load %arg6[%c0_10, %c0_11] : memref<128x128xbf16, #tpu.memory_space<vmem>>, vector<128x128xbf16>
      %c0_12 = arith.constant 0 : index
      %c0_13 = arith.constant 0 : index
      %17 = vector.load %arg8[%c0_12, %c0_13] : memref<128x128xf32, #tpu.memory_space<vmem>>, vector<128x128xf32>
      %18 = arith.truncf %17 : vector<128x128xf32> to vector<128x128xbf16>
      %cst_14 = arith.constant dense<0.000000e+00> : vector<128x128xf32>
      %19 = tpu.matmul %18, %15, %cst_14 {dimension_numbers = #tpu.dot_dimension_numbers<[1], [0], [0], [1], [0, 0, 1, 1], [], []>} : vector<128x128xbf16>, vector<128x128xbf16>, vector<128x128xf32> -> vector<128x128xf32>
      %c0_15 = arith.constant 0 : index
      %c0_16 = arith.constant 0 : index
      %20 = vector.load %arg5[%c0_15, %c0_16] : memref<1x128xf32, #tpu.memory_space<vmem>>, vector<1x128xf32>
      %21 = vector.broadcast %20 : vector<1x128xf32> to vector<128x128xf32>
      %22 = arith.addf %19, %21 : vector<128x128xf32>
      %cst_17 = arith.constant 0.000000e+00 : f32
      %23 = vector.broadcast %cst_17 : f32 to vector<128x128xf32>
      %24 = arith.maximumf %22, %23 : vector<128x128xf32>
      %25 = arith.truncf %24 : vector<128x128xf32> to vector<128x128xbf16>
      %cst_18 = arith.constant dense<0.000000e+00> : vector<128x128xf32>
      %26 = tpu.matmul %25, %16, %cst_18 {dimension_numbers = #tpu.dot_dimension_numbers<[1], [0], [0], [1], [0, 0, 1, 1], [], []>} : vector<128x128xbf16>, vector<128x128xbf16>, vector<128x128xf32> -> vector<128x128xf32>
      %27 = arith.truncf %26 : vector<128x128xf32> to vector<128x128xbf16>
      %c0_19 = arith.constant 0 : index
      %c0_20 = arith.constant 0 : index
      %28 = vector.load %arg7[%c0_19, %c0_20] : memref<128x128xbf16, #tpu.memory_space<vmem>>, vector<128x128xbf16>
      tpu.vector_store %arg7[%c0_19, %c0_20], %27 {strides = array<i32>} : memref<128x128xbf16, #tpu.memory_space<vmem>>, vector<128x128xbf16>,
    } else {
    }
    return
  }
  func.func @transform_0(%arg0: i32, %arg1: i32) -> (i32, i32) {
    %c0_i32 = arith.constant 0 : i32
    return %arg0, %arg1 : i32, i32
  }
  func.func @transform_1(%arg0: i32, %arg1: i32) -> (i32, i32) {
    %c0_i32 = arith.constant 0 : i32
    %c0_i32_0 = arith.constant 0 : i32
    %c0_i32_1 = arith.constant 0 : i32
    return %c0_i32, %c0_i32_0 : i32, i32
  }
  func.func @transform_2(%arg0: i32, %arg1: i32) -> (i32, i32) {
    %c0_i32 = arith.constant 0 : i32
    %c0_i32_0 = arith.constant 0 : i32
    %c0_i32_1 = arith.constant 0 : i32
    return %c0_i32, %c0_i32_0 : i32, i32
  }
  func.func @transform_3(%arg0: i32, %arg1: i32) -> (i32, i32) {
    %c0_i32 = arith.constant 0 : i32
    %c0_i32_0 = arith.constant 0 : i32
    %c0_i32_1 = arith.constant 0 : i32
    return %c0_i32, %c0_i32_0 : i32, i32
  }
  func.func @transform_4(%arg0: i32, %arg1: i32) -> (i32, i32) {
    %c0_i32 = arith.constant 0 : i32
    %c0_i32_0 = arith.constant 0 : i32
    %c0_i32_1 = arith.constant 0 : i32
    return %c0_i32, %c0_i32_0 : i32, i32
  }
  func.func @transform_5(%arg0: i32, %arg1: i32) -> (i32, i32) {
    %c0_i32 = arith.constant 0 : i32
    %c0_i32_0 = arith.constant 0 : i32
    return %arg0, %c0_i32 : i32, i32
  }
}

</mosaic_0001>

<bundles_post_ra>
// kernel: tpu_custom_call.1
= control target key start
LH: loop header
LB: loop body
LE: loop exit
PB: predicated region body
PF: predicated region fallthrough
CT: control target
= control target key end

     0   :  { %s2332_s0 = inlined_call_operand.hbm [shape: bf16[256,256], index: 0, kind: input, shape index: {}]   ;;  %s2333_s1 = inlined_call_operand.hbm [shape: bf16[256,128], index: 1, kind: input, shape index: {}]   ;;  %s2334_s2 = inlined_call_operand.hbm [shape: bf16[128,128], index: 2, kind: input, shape index: {}]   ;;  %s2335_s3 = inlined_call_operand.vmem [shape: f32[1,128], index: 3, kind: input, shape index: {}]   ;;  %s2336_s4 = inlined_call_operand.hbm [shape: bf16[128,128], index: 4, kind: input, shape index: {}]   ;;  %s2337_s5 = inlined_call_operand.hbm [shape: bf16[256,128], index: 5, kind: output, shape index: {}]  }
   0x1   :  { %2353 = sst [smem:[#allocation21_spill]] %s2333_s1 }
   0x2   :  { %2354 = sst [smem:[#allocation22_spill]] %s2334_s2 }
   0x3   :  { %2355 = sst [smem:[#allocation23_spill]] %s2337_s5 }
   0x4   :  { %10 = vsyncpa [#allocation4], 0 }
   0x5   :  { %12 = vsyncpa [#allocation4 + $0x1], 0 }
   0x6   :  { %13 = vsyncpa [#allocation7], 0 }
   0x7   :  { %14 = vsyncpa [#allocation10], 0 }
   0x8   :  { %15 = vsyncpa [#allocation5], 0 }
   0x9   :  { %17 = vsyncpa [#allocation5 + $0x1], 0  ;;  %s1954_s18 = smov 0   ;;  %s1956_s19 = smov 0  }
   0xa   :  { %s1958_s20 = smov 0   ;;  %s1960_s21 = smov 0  }
   0xb   :  { %s1962_s22 = smov 0   ;;  %s1964_s23 = smov 0  }
   0xc   :  { %s1966_s24 = smov 0   ;;  %s1968_s25 = smov 0  }
   0xd   :  { %s1970_s26 = smov 0   ;;  %s1972_s27 = smov 0  }
   0xe   :  { %s1974_s28 = smov 0  }
   0xf LB: > { %2356 = sst [smem:[#allocation16_spill]] %s1871_s18  ;;  %s1196_s29 = sadd.s32 4294967295, %s1911_s28   ;;  %s1911_s28 = sphi %s1974_s28, %s23_s28   ;;  %s1907_s27 = sphi %s1972_s27, %s2398_s27   ;;  %s1903_s26 = sphi %s1970_s26, %s2397_s26   ;;  %s1899_s25 = sphi %s1968_s25, %s2396_s25   ;;  %s1895_s24 = sphi %s1966_s24, %s2395_s24   ;;  %s1891_s23 = sphi %s1964_s23, %s2394_s23   ;;  %s1887_s22 = sphi %s1962_s22, %s2393_s22   ;;  %s1883_s21 = sphi %s1960_s21, %s2392_s21   ;;  %s1879_s20 = sphi %s1958_s20, %s2391_s20   ;;  %s1875_s19 = sphi %s1956_s19, %s2390_s19   ;;  %s1871_s18 = sphi %s1954_s18, %s2389_s18  }
  0x10   : > { %2357 = sst [smem:[#allocation17_spill]] %s1899_s25  ;;  %s1197_s30 = sadd.s32 4294967294, %s1911_s28  }
  0x11   : > { %2358 = sst [smem:[#allocation18_spill]] %s1911_s28  ;;  %p51_p0 = scmp.ne.s32.totalorder %s1891_s23, %s1887_s22 }
  0x12   : > { %p52_p1 = scmp.eq.s32.totalorder %s1911_s28, 0  ;;  %p57_p2 = scmp.ne.s32.totalorder %s1887_s22, %s1883_s21 }
  0x13   : > { %p2014_p3 = scmp.eq.s32.totalorder %s1196_s29, 0  ;;  %p164_p5 = scmp.ne.s32.totalorder %s1879_s20, %s1875_s19 }
  0x14   : > { %p2019_p4 = por %p52_p1, %p51_p0  ;;  %p165_p7 = scmp.eq.s32.totalorder %s1196_s29, 3 }
  0x15   : > { %s2359_s7 = scalar_select %p2014_p3, 1, 0 }
  0x16   : > { %p2027_p6 = por %p2014_p3, %p57_p2  ;;  %p170_p8 = scmp.ne.s32.totalorder %s1875_s19, %s1871_s18 }
  0x17   : > { %p171_p9 = scmp.eq.s32.totalorder %s1197_s30, 3  ;;  %p2033_p10 = por %p165_p7, %p164_p5 }
  0x18   : > { %s2361_s10 = scalar_select %p2027_p6, 1, 0 }
  0x19   : > { %s2362_s11 = scalar_select %p2033_p10, 1, 0 }
  0x1a   : > { %p1198_p11 = scmp.ge.s32.totalorder %s1911_s28, 1  ;;  %p2038_p12 = por %p171_p9, %p170_p8 }
  0x1b   : > { %2363 = sst [smem:[#allocation19_spill]] %s2362_s11  ;;  %p178_p13 = scmp.lt.s32.totalorder %s1911_s28, 5 }
  0x1c   : > { %s2364_s12 = scalar_select %p2038_p12, 1, 0 }
  0x1d   : > { %p2043_p0 = pnand %p1198_p11, %p178_p13  ;;  %s1913_s14 = smov [#allocation6]  }
  0x1e   : > { %2365 = sst [smem:[#allocation20_spill]] %s2364_s12  ;;  %s190_s15 = sshll.u32 %s1913_s14, 4  ;;  %s2047_s15 = int_to_ptr.vmem [resolvable:$true] %s190_s15 }
  0x1f   : > { %s2366_s13 = scalar_select %p2043_p0, 1, 0 }
  0x20   : > { %p1512_p1 = pneg %p2043_p0  ;;  %p1533_p2 = scmp.lt.s32.totalorder %s1911_s28, 4 }
  0x21   : > { %s1914_s21 = smov [#allocation8]   ;;  %s2369_s1 = sld [smem:[#allocation21_spill]] }
  0x22   : > { %p2054_p5 = pnand %p1512_p1, %p2014_p3  ;;  %p2060_p7 = pnand %p1533_p2, %p2019_p4 }
  0x23   : > { %s203_s29 = sshll.u32 %s1914_s21, 4  ;;  %s2064_s29 = int_to_ptr.vmem [resolvable:$true] %s203_s29 }
  0x24   : > { %s2368_s17 = scalar_select %p2060_p7, 1, 0 }
  0x25   : > { %p2074_p9 = pneg %p2054_p5 }
  0x27   : > { %s1667_s6 = scalar_lea.hbm %s2369_s1, 2048 }
  0x28   : > { %p1668_p8 = scmp.ne.s32.totalorder %s2369_s1, %s1667_s6  ;;  %p1674_p13 = scmp.lt.u32.totalorder %s1667_s6, %s2369_s1 }
  0x2a   : > { %p1670_p4 = pnand %p2074_p9, %p1668_p8 }
  0x2c   : > { %p1671_p11 = pneg %p1670_p4 }
  0x2e   : > { %p1676_p1 = pnand %p1674_p13, %p1671_p11 }
  0x30   : > { %1679 = shalt.err (!%p1676_p1)
}
  0x31   : > { %s1680_s8 = scalar_lea.vmem %s2047_s15, 2048  ;;  %p1688_p3 = scmp.lt.s32.totalorder %s2047_s15, %s2047_s15 }
  0x32   : > { %p1681_p2 = scmp.ne.s32.totalorder %s2047_s15, %s1680_s8  ;;  %p1689_p6 = scmp.lt.s32.totalorder %s1680_s8, %s1680_s8 }
  0x34   : > { %p1683_p12 = pnand %p1681_p2, %p2074_p9  ;;  %p1690_p8 = por %p1689_p6, %p1688_p3 }
  0x36   : > { %p1684_p10 = pneg %p1683_p12 }
  0x38   : > { %p1691_p4 = pnand %p1690_p8, %p1684_p10 }
  0x3a   : > { %1694 = shalt.err (!%p1691_p4)
}
  0x3b   : > { %s2351_s12 = smov 64   ;;  %s2352_s18 = smov 4  }
  0x3c   : > { %1515 = dma.hbm_to_vmem [thread:$0]  (!%p2054_p5), %s2369_s1, 2048, %s2047_s15, [#allocation7], %s2351_s12, %s2351_s12, %s2352_s18  }
  0x3d   : > { %s2371_s2 = sld [smem:[#allocation22_spill]] }
  0x43   : > { %s1695_s8 = scalar_lea.hbm %s2371_s2, 1024 }
  0x44   : > { %p1696_p3 = scmp.ne.s32.totalorder %s2371_s2, %s1695_s8  ;;  %p1702_p12 = scmp.lt.u32.totalorder %s1695_s8, %s2371_s2 }
  0x46   : > { %p1698_p6 = pnand %p1696_p3, %p2074_p9 }
  0x48   : > { %p1699_p10 = pneg %p1698_p6 }
  0x4a   : > { %p1704_p11 = pnand %p1702_p12, %p1699_p10 }
  0x4c   : > { %1707 = shalt.err (!%p1704_p11)
}
  0x4d   : > { %s1708_s15 = scalar_lea.vmem %s2064_s29, 1024  ;;  %p1716_p8 = scmp.lt.s32.totalorder %s2064_s29, %s2064_s29 }
  0x4e   : > { %p1709_p13 = scmp.ne.s32.totalorder %s2064_s29, %s1708_s15  ;;  %p1717_p4 = scmp.lt.s32.totalorder %s1708_s15, %s1708_s15 }
  0x50   : > { %p1711_p1 = pnand %p1709_p13, %p2074_p9  ;;  %p1718_p3 = por %p1717_p4, %p1716_p8 }
  0x52   : > { %p1712_p2 = pneg %p1711_p1 }
  0x54   : > { %p1719_p6 = pnand %p1718_p3, %p1712_p2 }
  0x56   : > { %1722 = shalt.err (!%p1719_p6)
}
  0x57   : > { %1518 = dma.hbm_to_vmem [thread:$0]  (!%p2054_p5), %s2371_s2, 1024, %s2064_s29, [#allocation7], %s2351_s12, %s2351_s12, %s2352_s18  }
  0x58   : > { %s1917_s28 = smov [#allocation9]   ;;  %s1723_s14 = scalar_lea.hbm %s2336_s4, 1024 }
  0x59   : > { %s219_s11 = sshll.u32 %s1917_s28, 4  ;;  %p1724_p10 = scmp.ne.s32.totalorder %s2336_s4, %s1723_s14  ;;  %s220_s11 = int_to_ptr.vmem [resolvable:$true] %s219_s11 }
  0x5a   : > { %p1730_p13 = scmp.lt.u32.totalorder %s1723_s14, %s2336_s4 }
  0x5b   : > { %p1726_p12 = pnand %p1724_p10, %p2074_p9 }
  0x5d   : > { %p1727_p11 = pneg %p1726_p12 }
  0x5f   : > { %p1732_p1 = pnand %p1730_p13, %p1727_p11 }
  0x61   : > { %1735 = shalt.err (!%p1732_p1)
}
  0x62   : > { %s1736_s29 = scalar_lea.vmem %s220_s11, 1024  ;;  %p1744_p3 = scmp.lt.s32.totalorder %s220_s11, %s220_s11 }
  0x63   : > { %p1737_p2 = scmp.ne.s32.totalorder %s220_s11, %s1736_s29  ;;  %p1745_p6 = scmp.lt.s32.totalorder %s1736_s29, %s1736_s29 }
  0x65   : > { %p1739_p8 = pnand %p1737_p2, %p2074_p9  ;;  %p1746_p0 = por %p1745_p6, %p1744_p3 }
  0x67   : > { %p1740_p4 = pneg %p1739_p8 }
  0x69   : > { %p1747_p7 = pnand %p1746_p0, %p1740_p4 }
  0x6b   : > { %1750 = shalt.err (!%p1747_p7)
}
  0x6c   : > { %1521 = dma.hbm_to_vmem [thread:$0]  (!%p2054_p5), %s2336_s4, 1024, %s220_s11, [#allocation10], %s2351_s12, %s2351_s12, %s2352_s18  }
  0x6d   : > { %s32_s9 = sadd.s32 1, %s1903_s26  ;;  %s35_s25 = sadd.s32 1, %s1907_s27 }
  0x6e   : > { %p33_p0 = scmp.ge.s32.totalorder %s32_s9, 2  ;;  %s233_s28 = sand.u32 1, %s1891_s23  }
  0x6f   : > { %s1203_s16 = sshll.u32 %s233_s28, 6  ;;  %s1271_s30 = sshll.u32 %s1907_s27, 5 }
  0x70   : > { %s2400_s9 = smov (%p33_p0, %s32_s9), 0  ;;  %s2402_s25 = smov (!%p33_p0, %s35_s25), %s1907_s27 }
  0x71   : > { %s40_s6 = ssub.s32 %s1903_s26, %s2400_s9  ;;  %p37_p7 = scmp.ge.s32.totalorder %s2402_s25, 2 }
  0x72   : > { %s243_s14 = sadd.s32 %s1903_s26, %s1271_s30  ;;  %s237_s11 = scalar_lea.vmem [#allocation3], %s1203_s16 }
  0x73   : > { %s246_s21 = sshll.u32 %s237_s11, 4  ;;  %s2404_s25 = smov (%p37_p7, %s2402_s25), 0  ;;  %s2157_s21 = int_to_ptr.vmem [resolvable:$true] %s246_s21 }
  0x74   : > { %s1206_s8 = sshll.u32 %s243_s14, 6  ;;  %s39_s15 = ssub.s32 %s1907_s27, %s2404_s25 }
  0x75   : > { %s2164_s5 = scalar_lea.hbm %s2332_s0, %s1206_s8  ;;  %s41_s30 = sor.u32 %s40_s6, %s39_s15 }
  0x76   : > { %p152_p5 = scmp.eq.s32.totalorder %s39_s15, 0  ;;  %p42_p9 = scmp.eq.s32.totalorder %s41_s30, 0 }
  0x77   : > { %s2372_s16 = sadd.s32 1, %s1879_s20  ;;  %s2373_s12 = sadd.s32 1, %s1891_s23 }
  0x78   : > { %s2169_s11 = scalar_select %p152_p5, %s1879_s20, %s2372_s16  }
  0x79   : > { %s2174_s14 = scalar_select %p42_p9, %s1891_s23, %s2373_s12  }
  0x7a   : > { %s2176_s18 = scalar_lea.sflag [#allocation4], %s233_s28  ;;  %s1751_s2 = scalar_lea.hbm %s2164_s5, 1024 }
  0x7b   : > { %p1752_p10 = scmp.ne.s32.totalorder %s2164_s5, %s1751_s2  ;;  %p2374_p12 = scmp.ne.s32.totalorder %s2368_s17, 0 }
  0x7c   : > { %s1756_s15 = scalar_lea.hbm %s2332_s0, 4096  ;;  %p1757_p2 = scmp.lt.u32.totalorder %s2164_s5, %s2332_s0 }
  0x7d   : > { %p1753_p11 = pneg %p2374_p12  ;;  %p1758_p8 = scmp.lt.u32.totalorder %s1756_s15, %s1751_s2 }
  0x7e   : > { %p1760_p3 = scmp.lt.u32.totalorder %s1751_s2, %s2164_s5 }
  0x7f   : > { %p1754_p13 = pnand %p1753_p11, %p1752_p10  ;;  %p1759_p4 = por %p1758_p8, %p1757_p2 }
  0x81   : > { %p1755_p1 = pneg %p1754_p13  ;;  %p1761_p6 = por %p1760_p3, %p1759_p4 }
  0x83   : > { %p1762_p0 = pnand %p1761_p6, %p1755_p1 }
  0x85   : > { %1765 = shalt.err (!%p1762_p0)
}
  0x86   : > { %s1766_s12 = scalar_lea.vmem %s2157_s21, 1024  ;;  %s1918_s28 = smov [#allocation3]  }
  0x87   : > { %p1767_p7 = scmp.ne.s32.totalorder %s2157_s21, %s1766_s12  ;;  %s1771_s30 = sshll.u32 %s1918_s28, 4  ;;  %s1772_s30 = int_to_ptr.vmem [resolvable:$false] %s1771_s30 }
  0x88   : > { %s1773_s16 = scalar_lea.vmem %s1772_s30, 2048  ;;  %p1774_p10 = scmp.lt.s32.totalorder %s2157_s21, %s1772_s30 }
  0x89   : > { %p1769_p5 = pnand %p1767_p7, %p1753_p11  ;;  %p1775_p13 = scmp.lt.s32.totalorder %s1773_s16, %s1766_s12 }
  0x8b   : > { %p1770_p9 = pneg %p1769_p5  ;;  %p1776_p2 = por %p1775_p13, %p1774_p10 }
  0x8d   : > { %p1777_p8 = pnand %p1776_p2, %p1770_p9 }
  0x8f   : > { %1780 = shalt.err (!%p1777_p8)
}
  0x90   : > { %s1919_s2 = smov 128   ;;  %s2375_s8 = smov 4  }
  0x91   : > { %s2376_s6 = smov 64   ;;  %p2377_p11 = scmp.ne.s32.totalorder %s2366_s13, 0 }
  0x92   : > { %1525 = dma.hbm_to_vmem [thread:$0]  (!%p2374_p12), %s2164_s5, 1024, %s2157_s21, %s2176_s18, %s1919_s2, %s2376_s6, %s2375_s8  }
  0x93   : > { %258 = sbr.rel (%p2377_p11) target bundleno = 927 (0x39f), region = 40  ;;  %s260_s15 = sand.u32 (!%p2377_p11), 1, %s1887_s22  }
  0x94   : > { %s1208_s29 = sshll.u32 (!%p2377_p11), %s260_s15, 6  ;;  %s261_s1 = scalar_lea.sflag (!%p2377_p11), [#allocation4], %s260_s15 }
  0x95   : > { %s2209_s12 = scalar_lea.vmem (!%p2377_p11), [#allocation3], %s1208_s29  ;;  %p2378_p1 = scmp.ne.s32.totalorder (!%p2377_p11), %s2361_s10, 0 }
  0x9a   : > { %1854 = dma.done.wait (%p2378_p1), %s261_s1, 1024  }
  0x9b   : > { %1856 = vsyncadd (%p2378_p1), %s261_s1, 4294966272  ;;  %p2379_p4 = scmp.ne.s32.totalorder %s2359_s7, 0 }
  0x9d   : > { %1858 = dma.done.wait (%p2379_p4), [#allocation7], 3072  }
  0x9e   : > { %1860 = vsyncadd (%p2379_p4), [#allocation7], 4294964224 }
  0x9f   : > { %1862 = dma.done.wait (%p2379_p4), [#allocation10], 1024  }
  0xa0   : > { %1864 = vsyncadd (%p2379_p4), [#allocation10], 4294966272  ;;  %s300_s13 = sand.u32 1, %s1875_s19   ;;  %p1213_p12 = scmp.ne.s32.totalorder %s1895_s24, 0 }
  0xa1   : > { %s1212_s17 = sshll.u32 %s300_s13, 6  ;;  %v1920_v0 = vmov (!%p1213_p12), 0.0  }
  0xa2   : > { %s2226_s18 = scalar_lea.vmem [#allocation11], %s1212_s17  ;;  %309 = sbr.rel (%p1213_p12) target bundleno = 170 (0xaa), region = 60  ;;  %310 = vst [vmem:[#allocation2] sm:$0xff] (!%p1213_p12), %v1920_v0  ;;  %311 = vst [vmem:[#allocation2 + $0x8] sm:$0xff] (!%p1213_p12), %v1920_v0 }
  0xa3   : > { %312 = vst [vmem:[#allocation2 + $0x10] sm:$0xff] (!%p1213_p12), %v1920_v0  ;;  %313 = vst [vmem:[#allocation2 + $0x18] sm:$0xff] (!%p1213_p12), %v1920_v0 }
  0xa4   : > { %314 = vst [vmem:[#allocation2 + $0x20] sm:$0xff] (!%p1213_p12), %v1920_v0  ;;  %315 = vst [vmem:[#allocation2 + $0x28] sm:$0xff] (!%p1213_p12), %v1920_v0 }
  0xa5   : > { %316 = vst [vmem:[#allocation2 + $0x30] sm:$0xff] (!%p1213_p12), %v1920_v0  ;;  %317 = vst [vmem:[#allocation2 + $0x38] sm:$0xff] (!%p1213_p12), %v1920_v0 }
  0xa6   : > { %318 = vst [vmem:[#allocation2 + $0x40] sm:$0xff] (!%p1213_p12), %v1920_v0  ;;  %319 = vst [vmem:[#allocation2 + $0x48] sm:$0xff] (!%p1213_p12), %v1920_v0 }
  0xa7   : > { %320 = vst [vmem:[#allocation2 + $0x50] sm:$0xff] (!%p1213_p12), %v1920_v0  ;;  %321 = vst [vmem:[#allocation2 + $0x58] sm:$0xff] (!%p1213_p12), %v1920_v0 }
  0xa8   : > { %322 = vst [vmem:[#allocation2 + $0x60] sm:$0xff] (!%p1213_p12), %v1920_v0  ;;  %323 = vst [vmem:[#allocation2 + $0x68] sm:$0xff] (!%p1213_p12), %v1920_v0 }
  0xa9   : > { %324 = vst [vmem:[#allocation2 + $0x70] sm:$0xff] %v1920_v0  ;;  %325 = vst [vmem:[#allocation2 + $0x78] sm:$0xff] %v1920_v0 }
  0xaa PF: > { %s1214_s7 = sshll.u32 %s1895_s24, 7  ;;  %v1643_v1 = vld [vmem:[%s2209_s12] sm:$0xff]   ;;  %v1645_v11 = vld [vmem:[%s2209_s12 + $0x8] sm:$0xff]   ;;  %v1647_v13 = vld [vmem:[%s2209_s12 + $0x10] sm:$0xff]   ;;  %p1232_p3 = scmp.ne.s32.totalorder %s1895_s24, 1 }
  0xab   : > { %s327_s10 = sshra.s32 %s1214_s7, 3  ;;  %v1644_v2 = vld [vmem:[%s2209_s12 + $0x20] sm:$0xff]   ;;  %1400 = vmatprep.mubr.bf16.mxu0 %v1643_v1  ;;  %v1646_v12 = vld [vmem:[%s2209_s12 + $0x28] sm:$0xff]   ;;  %v1648_v14 = vld [vmem:[%s2209_s12 + $0x30] sm:$0xff]  }
  0xac   : > { %s1215_s21 = sshll.u32 %s327_s10, 2  ;;  %1408 = vmatprep.mubr.bf16.mxu1 %v1644_v2  ;;  %v1649_v15 = vld [vmem:[%s2209_s12 + $0x18] sm:$0xff]   ;;  %v349_v17 = vld [vmem:[#allocation2 + $0x10] sm:$0xff]  ;;  %v347_v19 = vld [vmem:[#allocation2] sm:$0xff] }
  0xad   : > { %s2232_s5 = scalar_lea.vmem [#allocation6], %s1215_s21  ;;  %v1650_v16 = vld [vmem:[%s2209_s12 + $0x38] sm:$0xff]   ;;  %v348_v29 = vld [vmem:[#allocation2 + $0x8] sm:$0xff]  ;;  %v353_v41 = vld [vmem:[#allocation2 + $0x30] sm:$0xff] }
  0xae   : > { %v1635_v3 = vld [vmem:[%s2232_s5] sm:$0xff]   ;;  %v1636_v4 = vld [vmem:[%s2232_s5 + $0x8] sm:$0xff]   ;;  %v1637_v5 = vld [vmem:[%s2232_s5 + $0x10] sm:$0xff]  }
  0xaf   : > { %1384 = vmatprep.subr.bf16.mxu0 %v1635_v3  ;;  %1480 = vmatprep.subr.bf16.mxu1 %v1635_v3  ;;  %v1638_v6 = vld [vmem:[%s2232_s5 + $0x18] sm:$0xff]   ;;  %v1639_v7 = vld [vmem:[%s2232_s5 + $0x20] sm:$0xff]   ;;  %v1640_v8 = vld [vmem:[%s2232_s5 + $0x28] sm:$0xff]  }
  0xb0   : > { %1385 = vmatpush3.bf16.msra.mxu0 %v1635_v3  ;;  %1488 = vmatpush3.bf16.msra.mxu1 %v1635_v3  ;;  %v1641_v9 = vld [vmem:[%s2232_s5 + $0x30] sm:$0xff]   ;;  %v1642_v10 = vld [vmem:[%s2232_s5 + $0x38] sm:$0xff]   ;;  %v355_v20 = vld [vmem:[#allocation2 + $0x40] sm:$0xff] }
  0xb1   : > { %1386 = vmatprep.subr.bf16.mxu0 %v1636_v4  ;;  %1481 = vmatprep.subr.bf16.mxu1 %v1636_v4  ;;  %v357_v18 = vld [vmem:[#allocation2 + $0x50] sm:$0xff]  ;;  %v350_v23 = vld [vmem:[#allocation2 + $0x18] sm:$0xff]  ;;  %v356_v30 = vld [vmem:[#allocation2 + $0x48] sm:$0xff] }
  0xb2   : > { %v358_v24 = vld [vmem:[#allocation2 + $0x58] sm:$0xff]  ;;  %v361_v42 = vld [vmem:[#allocation2 + $0x70] sm:$0xff]  ;;  %v351_v43 = vld [vmem:[#allocation2 + $0x20] sm:$0xff] }
  0xb3   : > { %v359_v44 = vld [vmem:[#allocation2 + $0x60] sm:$0xff]  ;;  %v354_v47 = vld [vmem:[#allocation2 + $0x38] sm:$0xff]  ;;  %v352_v53 = vld [vmem:[#allocation2 + $0x28] sm:$0xff] }
  0xb4   : > { %1387 = vmatpush3.bf16.msra.mxu0 %v1636_v4  ;;  %1489 = vmatpush3.bf16.msra.mxu1 %v1636_v4  ;;  %v362_v48 = vld [vmem:[#allocation2 + $0x78] sm:$0xff]  ;;  %v360_v54 = vld [vmem:[#allocation2 + $0x68] sm:$0xff]  ;;  %v1651_v1 = vld [vmem:[#allocation8] sm:$0xff] (!%p1232_p3)  }
  0xb5   : > { %1388 = vmatprep.subr.bf16.mxu0 %v1637_v5  ;;  %1482 = vmatprep.subr.bf16.mxu1 %v1637_v5  ;;  %v1652_v2 = vld [vmem:[#allocation8 + $0x8] sm:$0xff] (!%p1232_p3)   ;;  %v1653_v3 = vld [vmem:[#allocation8 + $0x10] sm:$0xff] (!%p1232_p3)   ;;  %v1654_v4 = vld [vmem:[#allocation8 + $0x18] sm:$0xff] (!%p1232_p3)  }
  0xb8   : > { %1389 = vmatpush3.bf16.msra.mxu0 %v1637_v5  ;;  %1490 = vmatpush3.bf16.msra.mxu1 %v1637_v5 }
  0xb9   : > { %1390 = vmatprep.subr.bf16.mxu0 %v1638_v6  ;;  %1483 = vmatprep.subr.bf16.mxu1 %v1638_v6 }
  0xbc   : > { %1391 = vmatpush3.bf16.msra.mxu0 %v1638_v6  ;;  %1491 = vmatpush3.bf16.msra.mxu1 %v1638_v6 }
  0xbd   : > { %1392 = vmatprep.subr.bf16.mxu0 %v1639_v7  ;;  %1484 = vmatprep.subr.bf16.mxu1 %v1639_v7 }
  0xc0   : > { %1393 = vmatpush3.bf16.msra.mxu0 %v1639_v7  ;;  %1492 = vmatpush3.bf16.msra.mxu1 %v1639_v7 }
  0xc1   : > { %1394 = vmatprep.subr.bf16.mxu0 %v1640_v8  ;;  %1485 = vmatprep.subr.bf16.mxu1 %v1640_v8 }
  0xc4   : > { %1395 = vmatpush3.bf16.msra.mxu0 %v1640_v8  ;;  %1493 = vmatpush3.bf16.msra.mxu1 %v1640_v8  ;;  %v1655_v8 = vld [vmem:[#allocation8 + $0x20] sm:$0xff] (!%p1232_p3)  }
  0xc5   : > { %1396 = vmatprep.subr.bf16.mxu0 %v1641_v9  ;;  %1486 = vmatprep.subr.bf16.mxu1 %v1641_v9 }
  0xc8   : > { %1397 = vmatpush3.bf16.msra.mxu0 %v1641_v9  ;;  %1494 = vmatpush3.bf16.msra.mxu1 %v1641_v9  ;;  %v1659_v9 = vld [vmem:[#allocation9] sm:$0xff] (!%p1232_p3)  }
  0xc9   : > { %1398 = vmatprep.subr.bf16.mxu0 %v1642_v10  ;;  %1487 = vmatprep.subr.bf16.mxu1 %v1642_v10 }
  0xcc   : > { %1399 = vmatpush3.bf16.msra.mxu0 %v1642_v10  ;;  %1495 = vmatpush3.bf16.msra.mxu1 %v1642_v10  ;;  %v1660_v10 = vld [vmem:[#allocation9 + $0x8] sm:$0xff] (!%p1232_p3)  }
  0xcd   : > { %1416 = vmatprep.subr.bf16.mxu0 (!%p1232_p3), %v1651_v1  ;;  %1448 = vmatprep.subr.bf16.mxu1 (!%p1232_p3), %v1659_v9 }
  0xcf   : > { %1401 = vmatmul.mubr.bf16.vlgmr.msra.gmra.mrb[0].mxu0 %v1645_v11  ;;  %1409 = vmatmul.mubr.bf16.vlgmr.msra.gmra.mrb[0].mxu1 %v1646_v12  ;;  %v1656_v11 = vld [vmem:[#allocation8 + $0x28] sm:$0xff] (!%p1232_p3)   ;;  %v1661_v12 = vld [vmem:[#allocation9 + $0x10] sm:$0xff] (!%p1232_p3)  }
  0xd0   : > { %1404 = vmatprep.mubr.bf16.mxu0 %v1647_v13  ;;  %1412 = vmatprep.mubr.bf16.mxu1 %v1648_v14  ;;  %v1657_v13 = vld [vmem:[#allocation8 + $0x30] sm:$0xff] (!%p1232_p3)   ;;  %v1662_v14 = vld [vmem:[#allocation9 + $0x18] sm:$0xff] (!%p1232_p3)  }
  0xd1   : > { %1417 = vmatpush3.bf16.msra.mxu0 (!%p1232_p3), %v1651_v1  ;;  %1449 = vmatpush3.bf16.msra.mxu1 (!%p1232_p3), %v1659_v9 }
  0xd2   : > { %1418 = vmatprep.subr.bf16.mxu0 (!%p1232_p3), %v1652_v2  ;;  %1450 = vmatprep.subr.bf16.mxu1 (!%p1232_p3), %v1660_v10 }
  0xd5   : > { %1419 = vmatpush3.bf16.msra.mxu0 (!%p1232_p3), %v1652_v2  ;;  %1451 = vmatpush3.bf16.msra.mxu1 (!%p1232_p3), %v1660_v10 }
  0xd6   : > { %1420 = vmatprep.subr.bf16.mxu0 (!%p1232_p3), %v1653_v3  ;;  %1452 = vmatprep.subr.bf16.mxu1 (!%p1232_p3), %v1661_v12 }
  0xd7   : > { %1405 = vmatmul.mubr.bf16.gmra.mrb[4].mxu0 %v1649_v15  ;;  %1413 = vmatmul.mubr.bf16.gmra.mrb[4].mxu1 %v1650_v16  ;;  %v1658_v15 = vld [vmem:[#allocation8 + $0x38] sm:$0xff] (!%p1232_p3)   ;;  %v1663_v16 = vld [vmem:[#allocation9 + $0x20] sm:$0xff] (!%p1232_p3)  }
  0xd9   : > { %1421 = vmatpush3.bf16.msra.mxu0 (!%p1232_p3), %v1653_v3  ;;  %1453 = vmatpush3.bf16.msra.mxu1 (!%p1232_p3), %v1661_v12 }
  0xda   : > { %1422 = vmatprep.subr.bf16.mxu0 (!%p1232_p3), %v1654_v4  ;;  %1454 = vmatprep.subr.bf16.mxu1 (!%p1232_p3), %v1662_v14 }
  0xdd   : > { %1423 = vmatpush3.bf16.msra.mxu0 (!%p1232_p3), %v1654_v4  ;;  %1455 = vmatpush3.bf16.msra.mxu1 (!%p1232_p3), %v1662_v14 }
  0xde   : > { %1424 = vmatprep.subr.bf16.mxu0 (!%p1232_p3), %v1655_v8  ;;  %1456 = vmatprep.subr.bf16.mxu1 (!%p1232_p3), %v1663_v16 }
  0xe1   : > { %1425 = vmatpush3.bf16.msra.mxu0 (!%p1232_p3), %v1655_v8  ;;  %1457 = vmatpush3.bf16.msra.mxu1 (!%p1232_p3), %v1663_v16 }
  0xe2   : > { %1426 = vmatprep.subr.bf16.mxu0 (!%p1232_p3), %v1656_v11 }
  0xe5   : > { %1427 = vmatpush3.bf16.msra.mxu0 (!%p1232_p3), %v1656_v11 }
  0xe6   : > { %1428 = vmatprep.subr.bf16.mxu0 (!%p1232_p3), %v1657_v13 }
  0xe9   : > { %1429 = vmatpush3.bf16.msra.mxu0 (!%p1232_p3), %v1657_v13 }
  0xea   : > { %1430 = vmatprep.subr.bf16.mxu0 (!%p1232_p3), %v1658_v15 }
  0xed   : > { %1431 = vmatpush3.bf16.msra.mxu0 (!%p1232_p3), %v1658_v15 }
 0x1a2   : > { %v1402_v21 = vpop.f32.mrb[0].mxu0  ;;  %v1410_v22 = vpop.f32.mrb[0].mxu1 }
 0x1a3   : > { %v574_v25 = vadd.f32 %v1402_v21, %v349_v17  ;;  %v582_v26 = vadd.f32 %v1410_v22, %v357_v18  ;;  %v509_v27 = vpop.f32.mrb[1].mxu0  ;;  %v541_v28 = vpop.f32.mrb[1].mxu1  ;;  %v1664_v22 = vld [vmem:[#allocation9 + $0x28] sm:$0xff] (!%p1232_p3)  }
 0x1a4   : > { %v572_v31 = vadd.f32 %v509_v27, %v347_v19  ;;  %v580_v32 = vadd.f32 %v541_v28, %v355_v20  ;;  %v1403_v33 = vpop.f32.mrb[2].mxu0  ;;  %v1411_v34 = vpop.f32.mrb[2].mxu1  ;;  %1458 = vmatprep.subr.bf16.mxu1 (!%p1232_p3), %v1664_v22 }
 0x1a5   : > { %590 = vst [vmem:[#allocation2 + $0x10] sm:$0xff] %v574_v25  ;;  %598 = vst [vmem:[#allocation2 + $0x50] sm:$0xff] %v582_v26  ;;  %v575_v35 = vadd.f32 %v1403_v33, %v350_v23  ;;  %v583_v36 = vadd.f32 %v1411_v34, %v358_v24  ;;  %v512_v37 = vpop.f32.mrb[3].mxu0  ;;  %v544_v38 = vpop.f32.mrb[3].mxu1  ;;  %1459 = vmatpush3.bf16.msra.mxu1 (!%p1232_p3), %v1664_v22 }
 0x1a6   : > { %588 = vst [vmem:[#allocation2] sm:$0xff] %v572_v31  ;;  %596 = vst [vmem:[#allocation2 + $0x40] sm:$0xff] %v580_v32  ;;  %v573_v39 = vadd.f32 %v512_v37, %v348_v29  ;;  %v581_v40 = vadd.f32 %v544_v38, %v356_v30 }
 0x1a7   : > { %591 = vst [vmem:[#allocation2 + $0x18] sm:$0xff] %v575_v35  ;;  %599 = vst [vmem:[#allocation2 + $0x58] sm:$0xff] %v583_v36 }
 0x1a8   : > { %589 = vst [vmem:[#allocation2 + $0x8] sm:$0xff] %v573_v39  ;;  %597 = vst [vmem:[#allocation2 + $0x48] sm:$0xff] %v581_v40  ;;  %v1665_v39 = vld [vmem:[#allocation9 + $0x30] sm:$0xff] (!%p1232_p3)   ;;  %v1666_v40 = vld [vmem:[#allocation9 + $0x38] sm:$0xff] (!%p1232_p3)  }
 0x1a9   : > { %1460 = vmatprep.subr.bf16.mxu1 (!%p1232_p3), %v1665_v39 }
 0x1aa   : > { %v1406_v45 = vpop.f32.mrb[4].mxu0  ;;  %v1414_v46 = vpop.f32.mrb[4].mxu1  ;;  %607 = sbr.rel (%p1232_p3) target bundleno = 899 (0x383), region = 64  ;;  %1461 = vmatpush3.bf16.msra.mxu1 (!%p1232_p3), %v1665_v39 }
 0x1ab   : > { %v578_v49 = vadd.f32 %v1406_v45, %v353_v41  ;;  %v586_v50 = vadd.f32 %v1414_v46, %v361_v42  ;;  %v525_v51 = vpop.f32.mrb[5].mxu0  ;;  %v557_v52 = vpop.f32.mrb[5].mxu1  ;;  %1462 = vmatprep.subr.bf16.mxu1 (!%p1232_p3), %v1666_v40  ;;  %v1233_v41 = vld [vmem:[%s2335_s3] ss:$0 sm:$0xff] (!%p1232_p3) }
 0x1ac   : > { %v576_v55 = vadd.f32 %v525_v51, %v351_v43  ;;  %v584_v56 = vadd.f32 %v557_v52, %v359_v44  ;;  %v1407_v57 = vpop.f32.mrb[6].mxu0  ;;  %v1415_v58 = vpop.f32.mrb[6].mxu1  ;;  %v642_v17 = vld [vmem:[#allocation2 + $0x10] sm:$0xff] (!%p1232_p3) }
 0x1ad   : > { %594 = vst [vmem:[#allocation2 + $0x30] sm:$0xff] %v578_v49  ;;  %602 = vst [vmem:[#allocation2 + $0x70] sm:$0xff] %v586_v50  ;;  %v579_v59 = vadd.f32 %v1407_v57, %v354_v47  ;;  %v587_v60 = vadd.f32 %v1415_v58, %v362_v48  ;;  %v528_v61 = vpop.f32.mrb[7].mxu0  ;;  %v560_v62 = vpop.f32.mrb[7].mxu1  ;;  %v640_v5 = vld [vmem:[#allocation2] sm:$0xff] (!%p1232_p3)  ;;  %v650_v30 = vld [vmem:[#allocation2 + $0x50] sm:$0xff] (!%p1232_p3) }
 0x1ae   : > { %592 = vst [vmem:[#allocation2 + $0x20] sm:$0xff] %v576_v55  ;;  %600 = vst [vmem:[#allocation2 + $0x60] sm:$0xff] %v584_v56  ;;  %v577_v63 = vadd.f32 %v528_v61, %v352_v53  ;;  %v585_v0 = vadd.f32 %v560_v62, %v360_v54  ;;  %v643_v18 = vld [vmem:[#allocation2 + $0x18] sm:$0xff] (!%p1232_p3)  ;;  %v648_v26 = vld [vmem:[#allocation2 + $0x40] sm:$0xff] (!%p1232_p3)  ;;  %1463 = vmatpush3.bf16.msra.mxu1 (!%p1232_p3), %v1666_v40 }
 0x1af   : > { %595 = vst [vmem:[#allocation2 + $0x38] sm:$0xff] %v579_v59  ;;  %603 = vst [vmem:[#allocation2 + $0x78] sm:$0xff] %v587_v60  ;;  %v641_v6 = vld [vmem:[#allocation2 + $0x8] sm:$0xff] (!%p1232_p3)  ;;  %v657_v21 = vpack.c.bf16 (!%p1232_p3), %v643_v18, %v642_v17  ;;  %v651_v31 = vld [vmem:[#allocation2 + $0x58] sm:$0xff] (!%p1232_p3) }
 0x1b0   : > { %593 = vst [vmem:[#allocation2 + $0x28] sm:$0xff] %v577_v63  ;;  %601 = vst [vmem:[#allocation2 + $0x68] sm:$0xff] %v585_v0  ;;  %v656_v7 = vpack.c.bf16 (!%p1232_p3), %v641_v6, %v640_v5  ;;  %v649_v27 = vld [vmem:[#allocation2 + $0x48] sm:$0xff] (!%p1232_p3)  ;;  %v661_v34 = vpack.c.bf16 (!%p1232_p3), %v651_v31, %v650_v30 }
 0x1b1   : > { %v660_v29 = vpack.c.bf16 %v649_v27, %v648_v26 }
 0x1b2   : > { %1432 = vmatprep.mubr.bf16.mxu0 %v656_v7 }
 0x1b3   : > { %1433 = vmatmul.mubr.bf16.vlgmr.msra.gmra.mrb[0].mxu0 %v657_v21 }
 0x1b4   : > { %v646_v24 = vld [vmem:[#allocation2 + $0x30] sm:$0xff] }
 0x1b5   : > { %v644_v19 = vld [vmem:[#allocation2 + $0x20] sm:$0xff]  ;;  %v654_v36 = vld [vmem:[#allocation2 + $0x70] sm:$0xff] }
 0x1b6   : > { %v647_v25 = vld [vmem:[#allocation2 + $0x38] sm:$0xff]  ;;  %v652_v32 = vld [vmem:[#allocation2 + $0x60] sm:$0xff] }
 0x1b7   : > { %v645_v20 = vld [vmem:[#allocation2 + $0x28] sm:$0xff]  ;;  %v659_v28 = vpack.c.bf16 %v647_v25, %v646_v24  ;;  %v655_v37 = vld [vmem:[#allocation2 + $0x78] sm:$0xff] }
 0x1b8   : > { %v658_v23 = vpack.c.bf16 %v645_v20, %v644_v19  ;;  %v653_v33 = vld [vmem:[#allocation2 + $0x68] sm:$0xff]  ;;  %v663_v38 = vpack.c.bf16 %v655_v37, %v654_v36 }
 0x1b9   : > { %v662_v35 = vpack.c.bf16 %v653_v33, %v652_v32 }
 0x1ba   : > { %1436 = vmatprep.mubr.bf16.mxu0 %v658_v23 }
 0x1bb   : > { %1437 = vmatmul.mubr.bf16.gmra.mrb[4].mxu0 %v659_v28 }
 0x1bc   : > { %1440 = vmatprep.mubr.bf16.mxu0 %v660_v29 }
 0x1c3   : > { %1441 = vmatmul.mubr.bf16.gmra.mrb[8].mxu0 %v661_v34 }
 0x1c4   : > { %1444 = vmatprep.mubr.bf16.mxu0 %v662_v35 }
 0x1cb   : > { %1445 = vmatmul.mubr.bf16.gmra.mrb[12].mxu0 %v663_v38 }
 0x286   : > { %v1434_v42 = vpop.f32.mrb[0].mxu0 }
 0x287   : > { %v762_v43 = vadd.f32 %v1434_v42, %v1233_v41  ;;  %v753_v44 = vpop.f32.mrb[1].mxu0 }
 0x288   : > { %v754_v45 = vadd.f32 %v1233_v41, %v753_v44  ;;  %v1435_v46 = vpop.f32.mrb[2].mxu0 }
 0x289   : > { %v765_v47 = vadd.f32 %v1435_v46, %v1233_v41  ;;  %v756_v48 = vpop.f32.mrb[3].mxu0  ;;  %v818_v50 = vmax.f32 %v762_v43, 0.0 }
 0x28a   : > { %v757_v49 = vadd.f32 %v1233_v41, %v756_v48  ;;  %v816_v52 = vmax.f32 %v754_v45, 0.0 }
 0x28b   : > { %v819_v51 = vmax.f32 %v765_v47, 0.0 }
 0x28c   : > { %v817_v53 = vmax.f32 %v757_v49, 0.0 }
 0x28d   : > { %v833_v54 = vpack.c.bf16 %v819_v51, %v818_v50 }
 0x28e   : > { %v1438_v55 = vpop.f32.mrb[4].mxu0  ;;  %v832_v56 = vpack.c.bf16 %v817_v53, %v816_v52 }
 0x28f   : > { %v778_v57 = vadd.f32 %v1438_v55, %v1233_v41  ;;  %v769_v58 = vpop.f32.mrb[5].mxu0 }
 0x290   : > { %v770_v59 = vadd.f32 %v1233_v41, %v769_v58  ;;  %v1439_v60 = vpop.f32.mrb[6].mxu0  ;;  %1464 = vmatprep.mubr.bf16.mxu1 %v832_v56 }
 0x291   : > { %v781_v61 = vadd.f32 %v1439_v60, %v1233_v41  ;;  %v772_v62 = vpop.f32.mrb[7].mxu0  ;;  %1465 = vmatmul.mubr.bf16.vlgmr.msra.gmra.mrb[0].mxu1 %v833_v54  ;;  %v822_v0 = vmax.f32 %v778_v57, 0.0 }
 0x292   : > { %v773_v63 = vadd.f32 %v1233_v41, %v772_v62  ;;  %v820_v2 = vmax.f32 %v770_v59, 0.0 }
 0x293   : > { %v823_v1 = vmax.f32 %v781_v61, 0.0 }
 0x294   : > { %v821_v3 = vmax.f32 %v773_v63, 0.0 }
 0x295   : > { %v835_v4 = vpack.c.bf16 %v823_v1, %v822_v0 }
 0x296   : > { %v834_v5 = vpack.c.bf16 %v821_v3, %v820_v2  ;;  %v1442_v6 = vpop.f32.mrb[8].mxu0 }
 0x297   : > { %v794_v7 = vadd.f32 %v1442_v6, %v1233_v41  ;;  %v785_v8 = vpop.f32.mrb[9].mxu0 }
 0x298   : > { %v786_v9 = vadd.f32 %v1233_v41, %v785_v8  ;;  %v1443_v10 = vpop.f32.mrb[10].mxu0  ;;  %1468 = vmatprep.mubr.bf16.mxu1 %v834_v5 }
 0x299   : > { %v797_v11 = vadd.f32 %v1443_v10, %v1233_v41  ;;  %v788_v12 = vpop.f32.mrb[11].mxu0  ;;  %1469 = vmatmul.mubr.bf16.gmra.mrb[4].mxu1 %v835_v4  ;;  %v826_v14 = vmax.f32 %v794_v7, 0.0 }
 0x29a   : > { %v789_v13 = vadd.f32 %v1233_v41, %v788_v12  ;;  %v824_v16 = vmax.f32 %v786_v9, 0.0 }
 0x29b   : > { %v827_v15 = vmax.f32 %v797_v11, 0.0 }
 0x29c   : > { %v825_v17 = vmax.f32 %v789_v13, 0.0 }
 0x29d   : > { %v837_v18 = vpack.c.bf16 %v827_v15, %v826_v14 }
 0x29e   : > { %v836_v19 = vpack.c.bf16 %v825_v17, %v824_v16  ;;  %v1446_v20 = vpop.f32.mrb[12].mxu0 }
 0x29f   : > { %v810_v21 = vadd.f32 %v1446_v20, %v1233_v41  ;;  %v801_v22 = vpop.f32.mrb[13].mxu0 }
 0x2a0   : > { %v802_v23 = vadd.f32 %v1233_v41, %v801_v22  ;;  %v1447_v24 = vpop.f32.mrb[14].mxu0  ;;  %1472 = vmatprep.mubr.bf16.mxu1 %v836_v19 }
 0x2a1   : > { %v813_v25 = vadd.f32 %v1447_v24, %v1233_v41  ;;  %v804_v26 = vpop.f32.mrb[15].mxu0  ;;  %1473 = vmatmul.mubr.bf16.gmra.mrb[8].mxu1 %v837_v18  ;;  %v830_v28 = vmax.f32 %v810_v21, 0.0 }
 0x2a2   : > { %v805_v27 = vadd.f32 %v1233_v41, %v804_v26  ;;  %v828_v30 = vmax.f32 %v802_v23, 0.0 }
 0x2a3   : > { %v831_v29 = vmax.f32 %v813_v25, 0.0 }
 0x2a4   : > { %v829_v31 = vmax.f32 %v805_v27, 0.0 }
 0x2a5   : > { %v839_v32 = vpack.c.bf16 %v831_v29, %v830_v28 }
 0x2a6   : > { %v838_v33 = vpack.c.bf16 %v829_v31, %v828_v30 }
 0x2a8   : > { %1476 = vmatprep.mubr.bf16.mxu1 %v838_v33 }
 0x2a9   : > { %1477 = vmatmul.mubr.bf16.gmra.mrb[12].mxu1 %v839_v32 }
 0x364   : > { %v1466_v34 = vpop.f32.mrb[0].mxu1 }
 0x365   : > { %v922_v35 = vpop.f32.mrb[1].mxu1 }
 0x366   : > { %v1467_v36 = vpop.f32.mrb[2].mxu1 }
 0x367   : > { %v1297_v37 = vpack.c.bf16 %v1467_v36, %v1466_v34  ;;  %v925_v38 = vpop.f32.mrb[3].mxu1 }
 0x368   : > { %v1292_v39 = vpack.c.bf16 %v925_v38, %v922_v35 }
 0x369   : > { %1329 = vst [vmem:[%s2226_s18 + $0x8] sm:$0xff] %v1297_v37  }
 0x36a   : > { %1293 = vst [vmem:[%s2226_s18] sm:$0xff] %v1292_v39  }
 0x36c   : > { %v1470_v40 = vpop.f32.mrb[4].mxu1 }
 0x36d   : > { %v938_v41 = vpop.f32.mrb[5].mxu1 }
 0x36e   : > { %v1471_v42 = vpop.f32.mrb[6].mxu1 }
 0x36f   : > { %v1307_v43 = vpack.c.bf16 %v1471_v42, %v1470_v40  ;;  %v941_v44 = vpop.f32.mrb[7].mxu1 }
 0x370   : > { %v1302_v45 = vpack.c.bf16 %v941_v44, %v938_v41 }
 0x371   : > { %1331 = vst [vmem:[%s2226_s18 + $0x18] sm:$0xff] %v1307_v43  }
 0x372   : > { %1330 = vst [vmem:[%s2226_s18 + $0x10] sm:$0xff] %v1302_v45  }
 0x374   : > { %v1474_v46 = vpop.f32.mrb[8].mxu1 }
 0x375   : > { %v954_v47 = vpop.f32.mrb[9].mxu1 }
 0x376   : > { %v1475_v48 = vpop.f32.mrb[10].mxu1 }
 0x377   : > { %v1317_v49 = vpack.c.bf16 %v1475_v48, %v1474_v46  ;;  %v957_v50 = vpop.f32.mrb[11].mxu1 }
 0x378   : > { %v1312_v51 = vpack.c.bf16 %v957_v50, %v954_v47 }
 0x379   : > { %1333 = vst [vmem:[%s2226_s18 + $0x28] sm:$0xff] %v1317_v49  }
 0x37a   : > { %1332 = vst [vmem:[%s2226_s18 + $0x20] sm:$0xff] %v1312_v51  }
 0x37c   : > { %v1478_v52 = vpop.f32.mrb[12].mxu1 }
 0x37d   : > { %v970_v53 = vpop.f32.mrb[13].mxu1 }
 0x37e   : > { %v1479_v54 = vpop.f32.mrb[14].mxu1 }
 0x37f   : > { %v1327_v55 = vpack.c.bf16 %v1479_v54, %v1478_v52  ;;  %v973_v56 = vpop.f32.mrb[15].mxu1 }
 0x380   : > { %v1322_v57 = vpack.c.bf16 %v973_v56, %v970_v53 }
 0x381   : > { %1335 = vst [vmem:[%s2226_s18 + $0x38] sm:$0xff] %v1327_v55  }
 0x382   : > { %1334 = vst [vmem:[%s2226_s18 + $0x30] sm:$0xff] %v1322_v57  }
 0x383 PF: > { %s2380_s30 = sld [smem:[#allocation17_spill]]  ;;  %s2381_s16 = sld [smem:[#allocation19_spill]] }
 0x384   : > { %s2382_s15 = sld [smem:[#allocation23_spill]]  ;;  %s1079_s1 = sshll.u32 %s2226_s18, 4  ;;  %s2267_s1 = int_to_ptr.vmem [resolvable:$true] %s1079_s1 }
 0x385   : > { %s2271_s12 = scalar_lea.sflag [#allocation5], %s300_s13  ;;  %s1781_s17 = scalar_lea.vmem %s2267_s1, 1024 }
 0x386   : > { %p1782_p6 = scmp.ne.s32.totalorder %s2267_s1, %s1781_s17  ;;  %s1921_s7 = smov [#allocation11]  }
 0x387   : > { %s1785_s10 = sshll.u32 %s1921_s7, 4  ;;  %s1786_s10 = int_to_ptr.vmem [resolvable:$false] %s1785_s10 }
 0x388   : > { %s1787_s21 = scalar_lea.vmem %s1786_s10, 2048  ;;  %p1788_p9 = scmp.lt.s32.totalorder %s2267_s1, %s1786_s10 }
 0x389   : > { %s1288_s2 = sshll.u32 %s2380_s30, 10  ;;  %p2383_p0 = scmp.ne.s32.totalorder %s2381_s16, 0 }
 0x38a   : > { %s2264_s29 = scalar_lea.hbm %s2382_s15, %s1288_s2  ;;  %p1789_p10 = scmp.lt.s32.totalorder %s1787_s21, %s1781_s17 }
 0x38b   : > { %p1783_p7 = pnand %p1782_p6, %p2383_p0 }
 0x38c   : > { %p1790_p13 = por %p1789_p10, %p1788_p9 }
 0x38d   : > { %p1784_p5 = pneg %p1783_p7 }
 0x38f   : > { %p1791_p2 = pnand %p1790_p13, %p1784_p5 }
 0x391   : > { %1794 = shalt.err (!%p1791_p2)
}
 0x392   : > { %s1795_s13 = scalar_lea.hbm %s2264_s29, 1024  ;;  %s1799_s24 = scalar_lea.hbm %s2382_s15, 2048 }
 0x393   : > { %p1796_p8 = scmp.ne.s32.totalorder %s2264_s29, %s1795_s13  ;;  %p1800_p4 = scmp.lt.u32.totalorder %s2264_s29, %s2382_s15 }
 0x394   : > { %p1801_p12 = scmp.lt.u32.totalorder %s1799_s24, %s1795_s13  ;;  %p1803_p6 = scmp.lt.u32.totalorder %s1795_s13, %s2264_s29 }
 0x395   : > { %p1797_p11 = pnand %p1796_p8, %p2383_p0 }
 0x396   : > { %p1802_p3 = por %p1801_p12, %p1800_p4 }
 0x397   : > { %p1798_p1 = pneg %p1797_p11 }
 0x398   : > { %p1804_p7 = por %p1803_p6, %p1802_p3 }
 0x39a   : > { %p1805_p5 = pnand %p1804_p7, %p1798_p1 }
 0x39c   : > { %1808 = shalt.err (!%p1805_p5)
}
 0x39d   : > { %s1922_s2 = smov 64   ;;  %s1923_s8 = smov 4  }
 0x39e   : > { %1510 = dma.vmem_to_hbm [thread:$0]  (%p2383_p0), %s2267_s1, 1024, %s2264_s29, %s2271_s12, %s1922_s2, %s1922_s2, %s1923_s8  }
 0x39f PF: > { %s2384_s6 = sld [smem:[#allocation18_spill]]  ;;  %s2385_s17 = sld [smem:[#allocation16_spill]] }
 0x3a0   : > { %s2386_s7 = sld [smem:[#allocation20_spill]] }
 0x3a5   : > { %p1537_p9 = scmp.ge.s32.totalorder %s2384_s6, 2  ;;  %s1094_s10 = sand.u32 1, %s2385_s17  }
 0x3a6   : > { %p2387_p10 = scmp.ne.s32.totalorder %s2386_s7, 0  ;;  %s1095_s21 = scalar_lea.sflag [#allocation5], %s1094_s10 }
 0x3a8   : > { %p1527_p13 = pnand %p1537_p9, %p2387_p10 }
 0x3aa   : > { %1866 = dma.done.wait (!%p1527_p13), %s1095_s21, 1024  }
 0x3ab   : > { %1868 = vsyncadd (!%p1527_p13), %s1095_s21, 4294966272  ;;  %s23_s28 = sadd.s32 1, %s2384_s6   ;;  %s2388_s16 = smov %s2404_s25 }
 0x3ac   : > { %p20_p2 = scmp.ge.s32.totalorder %s23_s28, 6   ;;  %s2389_s18 = smov %s1875_s19 }
 0x3ad   : > { %s2390_s19 = smov %s1879_s20  ;;  %s2391_s20 = smov %s2169_s11 }
 0x3ae   : > { %s2392_s21 = smov %s1887_s22  ;;  %s2393_s22 = smov %s1891_s23 }
 0x3af   : > { %s2394_s23 = smov %s2174_s14  ;;  %s2395_s24 = smov %s1903_s26 }
 0x3b0   : > { %s2396_s25 = smov %s1907_s27  ;;  %s2397_s26 = smov %s2400_s9 }
 0x3b1   : > { %s2398_s27 = smov %s2388_s16  ;;  %22 = sbr.rel (!%p20_p2) target bundleno = 15 (0xf), region = 106 }
 0x3b8   :  { %1100 = vsyncpa [#allocation4], 1 }
 0x3b9   :  { %1102 = vsyncpa [#allocation4 + $0x1], 1 }
 0x3ba   :  { %1103 = vsyncpa [#allocation7], 1 }
 0x3bb   :  { %1104 = vsyncpa [#allocation10], 1 }
 0x3bc   :  { %1105 = vsyncpa [#allocation5], 1 }
 0x3bd   :  { %1107 = vsyncpa [#allocation5 + $0x1], 1 }

</bundles_post_ra>
